<compile_context>
chip_gen: v7x
topology: tpu7x:2x2x1
jax: 0.10.0
libtpu: 0.0.40
codegen_flags: <defaults>
</compile_context>

<pallas_src>
import jax
import jax.numpy as jnp
from jax.experimental import pallas as pl
from jax.experimental.pallas import tpu as pltpu


def _round_up(x, m):
    return ((x + m - 1) // m) * m


def _reduction_head_kernel(x_ref, w_ref, aff_ref, o_ref):
    # x_ref:   (tm, C)  batch rows at spatial position (0, 0) (bf16 operands)
    # w_ref:   (C, Rp)  1x1-conv weight with BN1 scale folded in (bf16)
    # aff_ref: (8, Rp)  f32; row 0 = BN1 shift, row 1 = BN2 scale, row 2 = BN2 shift
    # o_ref:   (tm, Rp) f32
    z = jnp.dot(x_ref[...], w_ref[...], preferred_element_type=jnp.float32)
    aff = aff_ref[...]
    z = z + aff[0:1, :]                         # BN1 shift (scale folded into w)
    y = jnp.where(z >= 0.0, z, 0.1 * z)         # LeakyReLU(0.1), f32 epilogue
    o_ref[...] = (y * aff[1:2, :] + aff[2:3, :]).astype(o_ref.dtype)  # bnneck BN


def prepare_reduction_head_params(conv_w, bn1, bn2, *, eps=1e-5,
                                  operand_dtype=jnp.bfloat16):
    """Fold BN1 into the 1x1-conv weight and pad to a lane-dense layout.

    Call once per parameter set (hoisted out of the per-forward path)."""
    R, C = conv_w.shape

    def fuse(bn):
        scale = bn["gamma"].astype(jnp.float32) / jnp.sqrt(
            bn["var"].astype(jnp.float32) + eps)
        shift = bn["beta"].astype(jnp.float32) - bn["mean"].astype(jnp.float32) * scale
        return scale, shift

    s1, b1 = fuse(bn1)
    s2, b2 = fuse(bn2)

    Rp = _round_up(R, 128)
    # Fold BN1's multiplicative scale into the weight (per output channel); the
    # additive shift stays as a pre-activation bias so LeakyReLU sees s1*z + b1.
    w = conv_w.astype(jnp.float32).T * s1[None, :]                 # (C, R)
    w_p = jnp.zeros((C, Rp), operand_dtype).at[:, :R].set(w.astype(operand_dtype))

    # Pack the three per-channel affines into one sublane-aligned (8, Rp) slab:
    # one DMA / one (single-buffered) VMEM block instead of three.
    aff = jnp.zeros((8, Rp), jnp.float32)
    aff = aff.at[0, :R].set(b1).at[1, :R].set(s2).at[2, :R].set(b2)

    return {"w": w_p, "aff": aff, "in_feat": C, "reduction_dim": R,
            "operand_dtype": operand_dtype}


def _vmem_capacity_bytes():
    try:
        cap = getattr(pltpu.get_tpu_info(), "vmem_capacity_bytes", None)
        if cap:
            return int(cap)
    except Exception:
        pass
    return 64 << 20   # conservative: v7x per-TensorCore VMEM


def reduction_head_apply(x_nchw, params, *, use_pallas=None):
    """x_nchw: (N, C, H, W). Returns (N, R) == ReductionHead(x)[..., 0, 0] (eval BN)."""
    C = params["in_feat"]
    R = params["reduction_dim"]
    w_p, aff = params["w"], params["aff"]
    op_dtype = params["operand_dtype"]
    Rp = w_p.shape[1]
    N = x_nchw.shape[0]
    assert x_nchw.shape[1] == C

    # Only the (0, 0) spatial position survives the forward pass.
    x00 = x_nchw[:, :, 0, 0].astype(op_dtype)                      # (N, C)

    if use_pallas is None:
        use_pallas = N >= 16
    if not use_pallas:
        # Tiny-batch serving path: one grid step of fixed overhead would
        # dominate, so let XLA fuse the small matmul + epilogue directly.
        z = jnp.dot(x00, w_p, preferred_element_type=jnp.float32)
        z = z + aff[0:1, :]
        y = jnp.where(z >= 0.0, z, 0.1 * z)
        return (y * aff[1:2, :] + aff[2:3, :])[:, :R]

    vmem_cap = _vmem_capacity_bytes()
    max_tm = 1024 if vmem_cap >= (96 << 20) else 512               # v5e/v6e vs v7x

    # Row tile: multiple of 16 (bf16 sublane packing); aim for >= 4 grid steps
    # so DMA/compute overlap and v7x's 2 TensorCores both get work.
    rows16 = _round_up(N, 16)
    tm = max(16, min(max_tm, _round_up(pl.cdiv(rows16, 4), 16)))
    Mr = max(N, tm)                  # rows padded only when N < tm (tiny batches)
    grid_m = pl.cdiv(Mr, tm)

    if Mr > N:
        x00 = jnp.zeros((Mr, C), op_dtype).at[:N].set(x00)

    op_bytes = jnp.dtype(op_dtype).itemsize
    # Buffer-count-aware worst case (x up to 3 buffers, weight/affines 2,
    # output 2, affines sublane-padded to 8 rows) + headroom.
    need = (3 * tm * C * op_bytes + 2 * C * Rp * op_bytes
            + 2 * 8 * Rp * 4 + 2 * tm * Rp * 4) + (2 << 20)
    vmem_bytes = int(min(max(need, 8 << 20), (vmem_cap * 3) // 4))

    cost = pl.CostEstimate(
        flops=2 * Mr * C * Rp,
        transcendentals=0,
        bytes_accessed=(Mr * C + C * Rp) * op_bytes + (8 * Rp + Mr * Rp) * 4)

    def build(single_buffer_params):
        if single_buffer_params:
            # Grid-invariant weight/affines: one VMEM buffer is enough; give
            # the streaming x input an extra buffer when the grid is deep.
            w_spec = pl.BlockSpec((C, Rp), lambda i: (0, 0),
                                  pipeline_mode=pl.Buffered(1))
            aff_spec = pl.BlockSpec((8, Rp), lambda i: (0, 0),
                                    pipeline_mode=pl.Buffered(1))
            x_mode = pl.Buffered(3) if grid_m > 2 else pl.Buffered(2)
            x_spec = pl.BlockSpec((tm, C), lambda i: (i, 0), pipeline_mode=x_mode)
        else:
            w_spec = pl.BlockSpec((C, Rp), lambda i: (0, 0))
            aff_spec = pl.BlockSpec((8, Rp), lambda i: (0, 0))
            x_spec = pl.BlockSpec((tm, C), lambda i: (i, 0))
        return pl.pallas_call(
            _reduction_head_kernel,
            out_shape=jax.ShapeDtypeStruct((Mr, Rp), jnp.float32),
            grid_spec=pltpu.PrefetchScalarGridSpec(
                num_scalar_prefetch=0,
                grid=(grid_m,),
                in_specs=[x_spec, w_spec, aff_spec],
                out_specs=pl.BlockSpec((tm, Rp), lambda i: (i, 0)),
            ),
            compiler_params=pltpu.CompilerParams(
                dimension_semantics=("parallel",),   # shard rows across TCs
                vmem_limit_bytes=vmem_bytes,
            ),
            cost_estimate=cost,
        )

    try:
        out = build(True)(x00, w_p, aff)
    except Exception:
        # pipeline_mode / pl.Buffered unsupported in this jax version:
        # fall back to default double-buffering (numerically identical).
        out = build(False)(x00, w_p, aff)

    return out[:N, :R]


def reduction_head_forward(x_nchw, conv_w, bn1, bn2, *, eps=1e-5,
                           operand_dtype=jnp.bfloat16, use_pallas=None):
    params = prepare_reduction_head_params(conv_w, bn1, bn2, eps=eps,
                                           operand_dtype=operand_dtype)
    return reduction_head_apply(x_nchw, params, use_pallas=use_pallas)


def _reference(x_nchw, conv_w, bn1, bn2, eps=1e-5):
    # Pure-JAX f32 reference computing the FULL map then slicing, to validate
    # that the slice-first kernel is numerically equivalent.
    N, C, H, W = x_nchw.shape
    R = conv_w.shape[0]
    y = jnp.einsum("nchw,rc->nrhw", x_nchw, conv_w)

    def bn(y, p):
        s = (p["gamma"] / jnp.sqrt(p["var"] + eps)).reshape(1, R, 1, 1)
        b = (p["beta"] - p["mean"] * p["gamma"] / jnp.sqrt(p["var"] + eps)).reshape(1, R, 1, 1)
        return y * s + b

    y = bn(y, bn1)
    y = jnp.where(y >= 0, y, 0.1 * y)
    y = bn(y, bn2)
    return y[..., 0, 0]


if __name__ == "__main__":
    key = jax.random.PRNGKey(0)
    N, C, H, W = 2, 4, 16, 16
    R = 32  # reduction_dim

    keys = jax.random.split(key, 10)
    x = jax.random.normal(keys[0], (N, C, H, W), dtype=jnp.float32)
    conv_w = jax.random.normal(keys[1], (R, C), dtype=jnp.float32) * 0.1

    bn1 = {
        "gamma": 1.0 + 0.05 * jax.random.normal(keys[2], (R,), dtype=jnp.float32),
        "beta": 0.05 * jax.random.normal(keys[3], (R,), dtype=jnp.float32),
        "mean": 0.05 * jax.random.normal(keys[4], (R,), dtype=jnp.float32),
        "var": jnp.abs(1.0 + 0.05 * jax.random.normal(keys[5], (R,), dtype=jnp.float32)),
    }
    bn2 = {
        "gamma": 1.0 + 0.05 * jax.random.normal(keys[6], (R,), dtype=jnp.float32),
        "beta": 0.05 * jax.random.normal(keys[7], (R,), dtype=jnp.float32),
        "mean": 0.05 * jax.random.normal(keys[8], (R,), dtype=jnp.float32),
        "var": jnp.abs(1.0 + 0.05 * jax.random.normal(keys[9], (R,), dtype=jnp.float32)),
    }

    # Parameter folding/padding done once (hoisted); forward forces the Pallas
    # path so the kernel actually runs at this demo size.
    params = prepare_reduction_head_params(conv_w, bn1, bn2)
    out = reduction_head_apply(x, params, use_pallas=True)
    out = jax.block_until_ready(out)

    ref = _reference(x, conv_w, bn1, bn2)
    assert out.shape == (N, R), out.shape
    # bf16 matmul operands (f32 accumulation / epilogue) -> loosened tolerance.
    assert jnp.allclose(out, ref, atol=2e-2, rtol=2e-2), float(jnp.max(jnp.abs(out - ref)))

    print("KERNEL_OK")
</pallas_src>

<mosaic_0001>
module attributes {stable_mosaic.version = 11 : i64} {
  func.func @_reduction_head_kernel(%arg0: i32, %arg1: memref<16x4xbf16, #tpu.memory_space<vmem>>, %arg2: memref<4x128xbf16, #tpu.memory_space<vmem>>, %arg3: memref<8x128xf32, #tpu.memory_space<vmem>>, %arg4: memref<16x128xf32, #tpu.memory_space<vmem>>) attributes {dimension_semantics = [#tpu.dimension_semantics<parallel>], iteration_bounds = array<i64: 1>, scalar_prefetch = 0 : i64, scratch_operands = 0 : i64, tpu.core_type = #tpu.core_type<tc>, window_params = [{pipeline_mode = #tpu.pipeline_mode<double_buffered>, transform_indices = @transform_0, window_bounds = array<i64: 16, 4>}, {pipeline_mode = #tpu.pipeline_mode<synchronous>, transform_indices = @transform_1, window_bounds = array<i64: 4, 128>}, {pipeline_mode = #tpu.pipeline_mode<synchronous>, transform_indices = @transform_2, window_bounds = array<i64: 8, 128>}, {transform_indices = @transform_3, window_bounds = array<i64: 16, 128>}]} {
    %c0 = arith.constant 0 : index
    %c0_0 = arith.constant 0 : index
    %0 = vector.load %arg1[%c0, %c0_0] : memref<16x4xbf16, #tpu.memory_space<vmem>>, vector<16x4xbf16>
    %c0_1 = arith.constant 0 : index
    %c0_2 = arith.constant 0 : index
    %1 = vector.load %arg2[%c0_1, %c0_2] : memref<4x128xbf16, #tpu.memory_space<vmem>>, vector<4x128xbf16>
    %cst = arith.constant dense<0.000000e+00> : vector<16x128xf32>
    %2 = tpu.matmul %0, %1, %cst {dimension_numbers = #tpu.dot_dimension_numbers<[1], [0], [0], [1], [0, 0, 1, 1], [], []>} : vector<16x4xbf16>, vector<4x128xbf16>, vector<16x128xf32> -> vector<16x128xf32>
    %c0_3 = arith.constant 0 : index
    %c0_4 = arith.constant 0 : index
    %3 = vector.load %arg3[%c0_3, %c0_4] : memref<8x128xf32, #tpu.memory_space<vmem>>, vector<8x128xf32>
    %4 = vector.extract_strided_slice %3 {offsets = [0, 0], sizes = [1, 128], strides = [1, 1]} : vector<8x128xf32> to vector<1x128xf32>
    %5 = vector.broadcast %4 : vector<1x128xf32> to vector<16x128xf32>
    %6 = arith.addf %2, %5 : vector<16x128xf32>
    %cst_5 = arith.constant 0.000000e+00 : f32
    %7 = vector.broadcast %cst_5 : f32 to vector<16x128xf32>
    %8 = arith.cmpf oge, %6, %7 : vector<16x128xf32>
    %cst_6 = arith.constant 1.000000e-01 : f32
    %9 = vector.broadcast %cst_6 : f32 to vector<16x128xf32>
    %10 = arith.mulf %9, %6 : vector<16x128xf32>
    %11 = arith.select %8, %6, %10 : vector<16x128xi1>, vector<16x128xf32>
    %12 = vector.extract_strided_slice %3 {offsets = [1, 0], sizes = [1, 128], strides = [1, 1]} : vector<8x128xf32> to vector<1x128xf32>
    %13 = vector.broadcast %12 : vector<1x128xf32> to vector<16x128xf32>
    %14 = arith.mulf %11, %13 : vector<16x128xf32>
    %15 = vector.extract_strided_slice %3 {offsets = [2, 0], sizes = [1, 128], strides = [1, 1]} : vector<8x128xf32> to vector<1x128xf32>
    %16 = vector.broadcast %15 : vector<1x128xf32> to vector<16x128xf32>
    %17 = arith.addf %14, %16 : vector<16x128xf32>
    %c0_7 = arith.constant 0 : index
    %c0_8 = arith.constant 0 : index
    %18 = vector.load %arg4[%c0_7, %c0_8] : memref<16x128xf32, #tpu.memory_space<vmem>>, vector<16x128xf32>
    tpu.vector_store %arg4[%c0_7, %c0_8], %17 {strides = array<i32>} : memref<16x128xf32, #tpu.memory_space<vmem>>, vector<16x128xf32>,
    return
  }
  func.func @transform_0(%arg0: i32) -> (i32, i32) {
    %c0_i32 = arith.constant 0 : i32
    %c0_i32_0 = arith.constant 0 : i32
    return %arg0, %c0_i32 : i32, i32
  }
  func.func @transform_1(%arg0: i32) -> (i32, i32) {
    %c0_i32 = arith.constant 0 : i32
    %c0_i32_0 = arith.constant 0 : i32
    %c0_i32_1 = arith.constant 0 : i32
    return %c0_i32, %c0_i32_0 : i32, i32
  }
  func.func @transform_2(%arg0: i32) -> (i32, i32) {
    %c0_i32 = arith.constant 0 : i32
    %c0_i32_0 = arith.constant 0 : i32
    %c0_i32_1 = arith.constant 0 : i32
    return %c0_i32, %c0_i32_0 : i32, i32
  }
  func.func @transform_3(%arg0: i32) -> (i32, i32) {
    %c0_i32 = arith.constant 0 : i32
    %c0_i32_0 = arith.constant 0 : i32
    return %arg0, %c0_i32 : i32, i32
  }
}

module attributes {stable_mosaic.version = 11 : i64} {
  func.func @_reduction_head_kernel(%arg0: i32, %arg1: memref<16x4xbf16, #tpu.memory_space<vmem>>, %arg2: memref<4x128xbf16, #tpu.memory_space<vmem>>, %arg3: memref<8x128xf32, #tpu.memory_space<vmem>>, %arg4: memref<16x128xf32, #tpu.memory_space<vmem>>) attributes {dimension_semantics = [#tpu.dimension_semantics<parallel>], iteration_bounds = array<i64: 1>, scalar_prefetch = 0 : i64, scratch_operands = 0 : i64, tpu.core_type = #tpu.core_type<tc>, window_params = [{transform_indices = @transform_0, window_bounds = array<i64: 16, 4>}, {pipeline_mode = #tpu.pipeline_mode<synchronous>, transform_indices = @transform_1, window_bounds = array<i64: 4, 128>}, {pipeline_mode = #tpu.pipeline_mode<synchronous>, transform_indices = @transform_2, window_bounds = array<i64: 8, 128>}, {transform_indices = @transform_3, window_bounds = array<i64: 16, 128>}]} {
    %c0 = arith.constant 0 : index
    %c0_0 = arith.constant 0 : index
    %0 = vector.load %arg1[%c0, %c0_0] : memref<16x4xbf16, #tpu.memory_space<vmem>>, vector<16x4xbf16>
    %c0_1 = arith.constant 0 : index
    %c0_2 = arith.constant 0 : index
    %1 = vector.load %arg2[%c0_1, %c0_2] : memref<4x128xbf16, #tpu.memory_space<vmem>>, vector<4x128xbf16>
    %cst = arith.constant dense<0.000000e+00> : vector<16x128xf32>
    %2 = tpu.matmul %0, %1, %cst {dimension_numbers = #tpu.dot_dimension_numbers<[1], [0], [0], [1], [0, 0, 1, 1], [], []>} : vector<16x4xbf16>, vector<4x128xbf16>, vector<16x128xf32> -> vector<16x128xf32>
    %c0_3 = arith.constant 0 : index
    %c0_4 = arith.constant 0 : index
    %3 = vector.load %arg3[%c0_3, %c0_4] : memref<8x128xf32, #tpu.memory_space<vmem>>, vector<8x128xf32>
    %4 = vector.extract_strided_slice %3 {offsets = [0, 0], sizes = [1, 128], strides = [1, 1]} : vector<8x128xf32> to vector<1x128xf32>
    %5 = vector.broadcast %4 : vector<1x128xf32> to vector<16x128xf32>
    %6 = arith.addf %2, %5 : vector<16x128xf32>
    %cst_5 = arith.constant 0.000000e+00 : f32
    %7 = vector.broadcast %cst_5 : f32 to vector<16x128xf32>
    %8 = arith.cmpf oge, %6, %7 : vector<16x128xf32>
    %cst_6 = arith.constant 1.000000e-01 : f32
    %9 = vector.broadcast %cst_6 : f32 to vector<16x128xf32>
    %10 = arith.mulf %9, %6 : vector<16x128xf32>
    %11 = arith.select %8, %6, %10 : vector<16x128xi1>, vector<16x128xf32>
    %12 = vector.extract_strided_slice %3 {offsets = [1, 0], sizes = [1, 128], strides = [1, 1]} : vector<8x128xf32> to vector<1x128xf32>
    %13 = vector.broadcast %12 : vector<1x128xf32> to vector<16x128xf32>
    %14 = arith.mulf %11, %13 : vector<16x128xf32>
    %15 = vector.extract_strided_slice %3 {offsets = [2, 0], sizes = [1, 128], strides = [1, 1]} : vector<8x128xf32> to vector<1x128xf32>
    %16 = vector.broadcast %15 : vector<1x128xf32> to vector<16x128xf32>
    %17 = arith.addf %14, %16 : vector<16x128xf32>
    %c0_7 = arith.constant 0 : index
    %c0_8 = arith.constant 0 : index
    %18 = vector.load %arg4[%c0_7, %c0_8] : memref<16x128xf32, #tpu.memory_space<vmem>>, vector<16x128xf32>
    tpu.vector_store %arg4[%c0_7, %c0_8], %17 {strides = array<i32>} : memref<16x128xf32, #tpu.memory_space<vmem>>, vector<16x128xf32>,
    return
  }
  func.func @transform_0(%arg0: i32) -> (i32, i32) {
    %c0_i32 = arith.constant 0 : i32
    %c0_i32_0 = arith.constant 0 : i32
    return %arg0, %c0_i32 : i32, i32
  }
  func.func @transform_1(%arg0: i32) -> (i32, i32) {
    %c0_i32 = arith.constant 0 : i32
    %c0_i32_0 = arith.constant 0 : i32
    %c0_i32_1 = arith.constant 0 : i32
    return %c0_i32, %c0_i32_0 : i32, i32
  }
  func.func @transform_2(%arg0: i32) -> (i32, i32) {
    %c0_i32 = arith.constant 0 : i32
    %c0_i32_0 = arith.constant 0 : i32
    %c0_i32_1 = arith.constant 0 : i32
    return %c0_i32, %c0_i32_0 : i32, i32
  }
  func.func @transform_3(%arg0: i32) -> (i32, i32) {
    %c0_i32 = arith.constant 0 : i32
    %c0_i32_0 = arith.constant 0 : i32
    return %arg0, %c0_i32 : i32, i32
  }
}

</mosaic_0001>

<bundles_post_ra>
// kernel: tpu_custom_call.1
= control target key start
LH: loop header
LB: loop body
LE: loop exit
PB: predicated region body
PF: predicated region fallthrough
CT: control target
= control target key end

     0   :  { %vm33_vm0 = vcmask 1041408   ;;  %v154_v1 = vmov 0.0   ;;  %vm155_vm1 = vmmov 0   ;;  %vm29_vm2 = vcmask 31744   ;;  %s200_s0 = inlined_call_operand.vmem [shape: bf16[16,4], index: 0, kind: input, shape index: {}]   ;;  %s201_s1 = inlined_call_operand.vmem [shape: bf16[4,128], index: 1, kind: input, shape index: {}]   ;;  %s202_s2 = inlined_call_operand.vmem [shape: f32[8,128], index: 2, kind: input, shape index: {}]   ;;  %s203_s3 = inlined_call_operand.hbm [shape: f32[16,128], index: 3, kind: output, shape index: {}]  }
   0x1   :  { %v18_v0 = vld [vmem:[%s201_s1] sm:$0x3]  ;;  %118 = vmatprep.subr.bf16.mxu0 %v154_v1  ;;  %120 = vmatprep.mubr.msk.bf16.mxu0 %vm155_vm1, %v154_v1 }
   0x2   :  { %v35_v2 = vsel %vm33_vm0, %v18_v0, 0  ;;  %v129_v3 = vld [vmem:[%s200_s0] sm:$0xff]  }
   0x3   :  { %119 = vmatpush3.bf16.msra.mxu0 %v35_v2 }
   0x4   :  { %8 = vsyncpa [#allocation3], 0  ;;  %v20_v4 = vlaneseq  ;;  %v19_v7 = vld [vmem:[%s202_s2] sm:$0xff]  ;;  %s156_s0 = smov [#allocation2]  }
   0x5   :  { %s103_s1 = sshll.u32 %s156_s0, 4  ;;  %s104_s1 = int_to_ptr.vmem [resolvable:$true] %s103_s1 }
   0x6   :  { %121 = vmatmul.mubr.msk.bf16.vlgmr.msra.gmra.mrb[0].mxu0 %vm29_vm2, %v129_v3  ;;  %v21_v5 = vshrl.u32 %v20_v4, 7  ;;  %s130_s2 = scalar_lea.vmem %s104_s1, 256  ;;  %p135_p1 = scmp.lt.s32.totalorder %s104_s1, %s104_s1 }
   0x7   :  { %p131_p0 = scmp.ne.s32.totalorder %s104_s1, %s130_s2  ;;  %p136_p2 = scmp.lt.s32.totalorder %s130_s2, %s130_s2 }
   0x8   :  { %v22_v6 = vsub.s32 0, %v21_v5  ;;  %v86_v9 = vsub.s32 1, %v21_v5  ;;  %v92_v11 = vsub.s32 2, %v21_v5 }
   0x9   :  { %p137_p3 = por %p136_p2, %p135_p1 }
   0xa   :  { %v23_v8 = vrot.slane %v19_v7, %v22_v6  ;;  %v87_v14 = vrot.slane %v19_v7, %v86_v9  ;;  %v93_v19 = vrot.slane %v19_v7, %v92_v11 }
   0xb   :  { %p138_p4 = pnand %p137_p3, %p131_p0 }
  0xd9   :  { %v71_v10 = vpop.f32.mrb[0].mxu0 }
  0xda   :  { %v72_v12 = vadd.f32 %v71_v10, %v23_v8  ;;  %v122_v13 = vpop.f32.mrb[1].mxu0 }
  0xdb   :  { %v74_v15 = vpop.f32.mrb[2].mxu0 }
  0xdc   :  { %vm78_vm3 = vcmp.ge.f32.partialorder %v72_v12, 0.0  ;;  %v80_v16 = vmul.f32 0.1, %v72_v12  ;;  %v75_v17 = vadd.f32 %v74_v15, %v23_v8  ;;  %v123_v18 = vpop.f32.mrb[3].mxu0 }
  0xde   :  { %v82_v20 = vsel %vm78_vm3, %v72_v12, %v80_v16  ;;  %vm79_vm4 = vcmp.ge.f32.partialorder %v75_v17, 0.0  ;;  %v81_v21 = vmul.f32 0.1, %v75_v17 }
  0xdf   :  { %v88_v22 = vmul.f32 %v87_v14, %v82_v20 }
  0xe0   :  { %v83_v23 = vsel %vm79_vm4, %v75_v17, %v81_v21 }
  0xe1   :  { %v94_v24 = vadd.f32 %v93_v19, %v88_v22  ;;  %v89_v25 = vmul.f32 %v87_v14, %v83_v23 }
  0xe3   :  { %96 = vst [vmem:[#allocation2] sm:$0xff] %v94_v24  ;;  %v95_v26 = vadd.f32 %v93_v19, %v89_v25 }
  0xe5   :  { %97 = vst [vmem:[#allocation2 + $0x8] sm:$0xff] %v95_v26 }
  0xe6   :  { %141 = shalt.err (!%p138_p4)
}
  0xe7   :  { %s142_s20 = scalar_lea.hbm %s203_s3, 256 }
  0xe8   :  { %p143_p5 = scmp.ne.s32.totalorder %s203_s3, %s142_s20  ;;  %p146_p6 = scmp.lt.u32.totalorder %s142_s20, %s203_s3 }
  0xea   :  { %p148_p7 = pnand %p146_p6, %p143_p5 }
  0xec   :  { %151 = shalt.err (!%p148_p7)
}
  0xed   :  { %s157_s25 = smov 128   ;;  %s158_s26 = smov 8  }
  0xee   :  { %109 = dma.vmem_to_hbm [thread:$0]  %s104_s1, 256, %s203_s3, [#allocation3], %s157_s25, %s157_s25, %s158_s26  }
  0xef   :  { %152 = dma.done.wait [#allocation3], 256  }
  0xf0   :  { %153 = vsyncadd [#allocation3], 4294967040 }
  0xf1   :  { %113 = vsyncpa [#allocation3], 1 }

// kernel: tpu_custom_call.1
= control target key start
LH: loop header
LB: loop body
LE: loop exit
PB: predicated region body
PF: predicated region fallthrough
CT: control target
= control target key end

     0   :  { %vm33_vm0 = vcmask 1041408   ;;  %v154_v1 = vmov 0.0   ;;  %vm155_vm1 = vmmov 0   ;;  %vm29_vm2 = vcmask 31744   ;;  %s200_s0 = inlined_call_operand.vmem [shape: bf16[16,4], index: 0, kind: input, shape index: {}]   ;;  %s201_s1 = inlined_call_operand.vmem [shape: bf16[4,128], index: 1, kind: input, shape index: {}]   ;;  %s202_s2 = inlined_call_operand.vmem [shape: f32[8,128], index: 2, kind: input, shape index: {}]   ;;  %s203_s3 = inlined_call_operand.hbm [shape: f32[16,128], index: 3, kind: output, shape index: {}]  }
   0x1   :  { %v18_v0 = vld [vmem:[%s201_s1] sm:$0x3]  ;;  %118 = vmatprep.subr.bf16.mxu0 %v154_v1  ;;  %120 = vmatprep.mubr.msk.bf16.mxu0 %vm155_vm1, %v154_v1 }
   0x2   :  { %v35_v2 = vsel %vm33_vm0, %v18_v0, 0  ;;  %v129_v3 = vld [vmem:[%s200_s0] sm:$0xff]  }
   0x3   :  { %119 = vmatpush3.bf16.msra.mxu0 %v35_v2 }
   0x4   :  { %8 = vsyncpa [#allocation3], 0  ;;  %v20_v4 = vlaneseq  ;;  %v19_v7 = vld [vmem:[%s202_s2] sm:$0xff]  ;;  %s156_s0 = smov [#allocation2]  }
   0x5   :  { %s103_s1 = sshll.u32 %s156_s0, 4  ;;  %s104_s1 = int_to_ptr.vmem [resolvable:$true] %s103_s1 }
   0x6   :  { %121 = vmatmul.mubr.msk.bf16.vlgmr.msra.gmra.mrb[0].mxu0 %vm29_vm2, %v129_v3  ;;  %v21_v5 = vshrl.u32 %v20_v4, 7  ;;  %s130_s2 = scalar_lea.vmem %s104_s1, 256  ;;  %p135_p1 = scmp.lt.s32.totalorder %s104_s1, %s104_s1 }
   0x7   :  { %p131_p0 = scmp.ne.s32.totalorder %s104_s1, %s130_s2  ;;  %p136_p2 = scmp.lt.s32.totalorder %s130_s2, %s130_s2 }
   0x8   :  { %v22_v6 = vsub.s32 0, %v21_v5  ;;  %v86_v9 = vsub.s32 1, %v21_v5  ;;  %v92_v11 = vsub.s32 2, %v21_v5 }
   0x9   :  { %p137_p3 = por %p136_p2, %p135_p1 }
   0xa   :  { %v23_v8 = vrot.slane %v19_v7, %v22_v6  ;;  %v87_v14 = vrot.slane %v19_v7, %v86_v9  ;;  %v93_v19 = vrot.slane %v19_v7, %v92_v11 }
   0xb   :  { %p138_p4 = pnand %p137_p3, %p131_p0 }
  0xd9   :  { %v71_v10 = vpop.f32.mrb[0].mxu0 }
  0xda   :  { %v72_v12 = vadd.f32 %v71_v10, %v23_v8  ;;  %v122_v13 = vpop.f32.mrb[1].mxu0 }
  0xdb   :  { %v74_v15 = vpop.f32.mrb[2].mxu0 }
  0xdc   :  { %vm78_vm3 = vcmp.ge.f32.partialorder %v72_v12, 0.0  ;;  %v80_v16 = vmul.f32 0.1, %v72_v12  ;;  %v75_v17 = vadd.f32 %v74_v15, %v23_v8  ;;  %v123_v18 = vpop.f32.mrb[3].mxu0 }
  0xde   :  { %v82_v20 = vsel %vm78_vm3, %v72_v12, %v80_v16  ;;  %vm79_vm4 = vcmp.ge.f32.partialorder %v75_v17, 0.0  ;;  %v81_v21 = vmul.f32 0.1, %v75_v17 }
  0xdf   :  { %v88_v22 = vmul.f32 %v87_v14, %v82_v20 }
  0xe0   :  { %v83_v23 = vsel %vm79_vm4, %v75_v17, %v81_v21 }
  0xe1   :  { %v94_v24 = vadd.f32 %v93_v19, %v88_v22  ;;  %v89_v25 = vmul.f32 %v87_v14, %v83_v23 }
  0xe3   :  { %96 = vst [vmem:[#allocation2] sm:$0xff] %v94_v24  ;;  %v95_v26 = vadd.f32 %v93_v19, %v89_v25 }
  0xe5   :  { %97 = vst [vmem:[#allocation2 + $0x8] sm:$0xff] %v95_v26 }
  0xe6   :  { %141 = shalt.err (!%p138_p4)
}
  0xe7   :  { %s142_s20 = scalar_lea.hbm %s203_s3, 256 }
  0xe8   :  { %p143_p5 = scmp.ne.s32.totalorder %s203_s3, %s142_s20  ;;  %p146_p6 = scmp.lt.u32.totalorder %s142_s20, %s203_s3 }
  0xea   :  { %p148_p7 = pnand %p146_p6, %p143_p5 }
  0xec   :  { %151 = shalt.err (!%p148_p7)
}
  0xed   :  { %s157_s25 = smov 128   ;;  %s158_s26 = smov 8  }
  0xee   :  { %109 = dma.vmem_to_hbm [thread:$0]  %s104_s1, 256, %s203_s3, [#allocation3], %s157_s25, %s157_s25, %s158_s26  }
  0xef   :  { %152 = dma.done.wait [#allocation3], 256  }
  0xf0   :  { %153 = vsyncadd [#allocation3], 4294967040 }
  0xf1   :  { %113 = vsyncpa [#allocation3], 1 }

</bundles_post_ra>
